<compile_context>
chip_gen: v7x
topology: tpu7x:2x2x1
jax: 0.10.0
libtpu: 0.0.40
codegen_flags: <defaults>
</compile_context>

<pallas_src>
import numpy as np
import jax
import jax.numpy as jnp
from jax.experimental import pallas as pl
from jax.experimental.pallas import tpu as pltpu

# Static geometry implied by the module: fc1.in_features = 256 = 4 * 8 * 8
# => input is [N, 1, 28, 28] (MNIST-like), conv output is [N, 4, 8, 8].
_CIN, _IH, _IW = 1, 28, 28
_COUT, _KH, _KW, _STRIDE = 4, 7, 7, 3
_OH = (_IH - _KH) // _STRIDE + 1           # 8
_OW = (_IW - _KW) // _STRIDE + 1           # 8
_CONV_FLAT = _COUT * _OH * _OW             # 256
_KIN = _CIN * _IH * _IW                    # 784
_KIN_PAD = ((_KIN + 127) // 128) * 128     # 896 (lane-aligned contraction dim)


def _round_up(x, m):
    return (x + m - 1) // m * m


# ----------------------------- Pallas kernel --------------------------------
def _fused_forward_kernel(x_ref, wc_ref, bc_ref, w1_ref, b1_ref, w2_ref, b2_ref,
                          o_ref):
    # conv-as-matmul (already in PyTorch flatten order) + bias, then x*x
    h = jnp.dot(x_ref[...], wc_ref[...], preferred_element_type=jnp.float32)
    h = h + bc_ref[...]
    h = h * h
    # fc1 + bias, then x*x
    h = jnp.dot(h, w1_ref[...], preferred_element_type=jnp.float32) + b1_ref[...]
    h = h * h
    # fc2 + bias
    out = jnp.dot(h, w2_ref[...], preferred_element_type=jnp.float32) + b2_ref[...]
    o_ref[...] = out.astype(o_ref.dtype)


# ------------------------------ glue (JAX) -----------------------------------
def _conv_as_matrix(w_oihw):
    """Embed the 7x7 stride-3 VALID conv into a dense [896, 256] matrix.

    Column j = c*64 + oh*8 + ow matches torch.nn.Flatten() applied to the NCHW
    conv output, so x_flat @ W directly yields fc1's input layout.
    """
    c, oh, ow, kh, kw = np.meshgrid(
        np.arange(_COUT), np.arange(_OH), np.arange(_OW),
        np.arange(_KH), np.arange(_KW), indexing="ij")
    rows = ((oh * _STRIDE + kh) * _IW + (ow * _STRIDE + kw)).ravel()
    cols = (c * (_OH * _OW) + oh * _OW + ow).ravel()
    vals = w_oihw[c.ravel(), 0, kh.ravel(), kw.ravel()].astype(jnp.float32)
    wmat = jnp.zeros((_KIN_PAD, _CONV_FLAT), jnp.float32)
    return wmat.at[rows, cols].set(vals)


def simple_convnet_forward(params, x_nchw, tm=512):
    N = x_nchw.shape[0]
    hidden = params["fc1_w"].shape[0]
    out_dim = params["fc2_w"].shape[0]

    # One-time wrapper-side weight/bias preparation (folded layout plumbing).
    wc = _conv_as_matrix(params["conv1_w"])                              # [896, 256]
    bc = jnp.repeat(params["conv1_b"].astype(jnp.float32),
                    _OH * _OW).reshape(1, _CONV_FLAT)                    # [1, 256]
    w1 = params["fc1_w"].astype(jnp.float32).T                           # [256, hidden]
    b1 = params["fc1_b"].astype(jnp.float32).reshape(1, hidden)
    w2 = params["fc2_w"].astype(jnp.float32).T                           # [hidden, out]
    b2 = params["fc2_b"].astype(jnp.float32).reshape(1, out_dim)

    # Flatten input; pad only the batch axis (to the row tile) and K lanes.
    x_flat = x_nchw.reshape(N, _KIN).astype(jnp.float32)
    tm = min(tm, _round_up(N, 8))
    n_pad = _round_up(N, tm)
    x_p = jnp.pad(x_flat, ((0, n_pad - N), (0, _KIN_PAD - _KIN)))

    out = pl.pallas_call(
        _fused_forward_kernel,
        out_shape=jax.ShapeDtypeStruct((n_pad, out_dim), jnp.float32),
        grid_spec=pltpu.PrefetchScalarGridSpec(
            num_scalar_prefetch=0,
            grid=(n_pad // tm,),
            in_specs=[
                pl.BlockSpec((tm, _KIN_PAD), lambda i: (i, 0)),          # x tile
                pl.BlockSpec((_KIN_PAD, _CONV_FLAT), lambda i: (0, 0)),  # conv mat (resident)
                pl.BlockSpec((1, _CONV_FLAT), lambda i: (0, 0)),         # conv bias
                pl.BlockSpec((_CONV_FLAT, hidden), lambda i: (0, 0)),    # fc1 weight
                pl.BlockSpec((1, hidden), lambda i: (0, 0)),             # fc1 bias
                pl.BlockSpec((hidden, out_dim), lambda i: (0, 0)),       # fc2 weight
                pl.BlockSpec((1, out_dim), lambda i: (0, 0)),            # fc2 bias
            ],
            out_specs=pl.BlockSpec((tm, out_dim), lambda i: (i, 0)),
        ),
        compiler_params=pltpu.CompilerParams(
            dimension_semantics=("parallel",)),
    )(x_p, wc, bc, w1, b1, w2, b2)
    return out[:N]


# ------------------------------ parameters -----------------------------------
def init_params(key, hidden=64, output=10):
    # PyTorch-default-style uniform(-1/sqrt(fan_in), 1/sqrt(fan_in)) init.
    def u(k, shape, fan_in):
        bound = 1.0 / np.sqrt(fan_in)
        return jax.random.uniform(k, shape, jnp.float32, -bound, bound)

    ks = jax.random.split(key, 6)
    return {
        "conv1_w": u(ks[0], (_COUT, _CIN, _KH, _KW), _KH * _KW * _CIN),
        "conv1_b": u(ks[1], (_COUT,), _KH * _KW * _CIN),
        "fc1_w": u(ks[2], (hidden, _CONV_FLAT), _CONV_FLAT),
        "fc1_b": u(ks[3], (hidden,), _CONV_FLAT),
        "fc2_w": u(ks[4], (output, hidden), hidden),
        "fc2_b": u(ks[5], (output,), hidden),
    }


# --------------------------- pure-JAX reference ------------------------------
def reference_forward(params, x_nchw):
    y = jax.lax.conv_general_dilated(
        x_nchw, params["conv1_w"], window_strides=(_STRIDE, _STRIDE),
        padding="VALID", dimension_numbers=("NCHW", "OIHW", "NCHW"))
    y = y + params["conv1_b"][None, :, None, None]
    y = y * y
    y = y.reshape(y.shape[0], -1)
    y = y @ params["fc1_w"].T + params["fc1_b"]
    y = y * y
    y = y @ params["fc2_w"].T + params["fc2_b"]
    return y


if __name__ == "__main__":
    key = jax.random.PRNGKey(0)
    pkey, xkey = jax.random.split(key)
    params = init_params(pkey)
    # batch=2, channels=1, spatial=28 (implied by fc1.in_features=256)
    x = jax.random.normal(xkey, (2, _CIN, _IH, _IW), jnp.float32)

    out = jax.block_until_ready(jax.jit(simple_convnet_forward)(params, x))
    ref = jax.block_until_ready(reference_forward(params, x))

    assert out.shape == (2, 10), out.shape
    assert jnp.allclose(out, ref, rtol=1e-4, atol=1e-4), (
        float(jnp.max(jnp.abs(out - ref))))
    print("KERNEL_OK")
</pallas_src>

<mosaic_0001>
module attributes {stable_mosaic.version = 11 : i64} {
  func.func @_fused_forward_kernel(%arg0: i32, %arg1: memref<8x896xf32, #tpu.memory_space<vmem>>, %arg2: memref<896x256xf32, #tpu.memory_space<vmem>>, %arg3: memref<1x256xf32, #tpu.memory_space<vmem>>, %arg4: memref<256x64xf32, #tpu.memory_space<vmem>>, %arg5: memref<1x64xf32, #tpu.memory_space<vmem>>, %arg6: memref<64x10xf32, #tpu.memory_space<vmem>>, %arg7: memref<1x10xf32, #tpu.memory_space<vmem>>, %arg8: memref<8x10xf32, #tpu.memory_space<vmem>>) attributes {dimension_semantics = [#tpu.dimension_semantics<parallel>], iteration_bounds = array<i64: 1>, scalar_prefetch = 0 : i64, scratch_operands = 0 : i64, tpu.core_type = #tpu.core_type<tc>, window_params = [{transform_indices = @transform_0, window_bounds = array<i64: 8, 896>}, {pipeline_mode = #tpu.pipeline_mode<synchronous>, transform_indices = @transform_1, window_bounds = array<i64: 896, 256>}, {pipeline_mode = #tpu.pipeline_mode<synchronous>, transform_indices = @transform_2, window_bounds = array<i64: 1, 256>}, {pipeline_mode = #tpu.pipeline_mode<synchronous>, transform_indices = @transform_3, window_bounds = array<i64: 256, 64>}, {pipeline_mode = #tpu.pipeline_mode<synchronous>, transform_indices = @transform_4, window_bounds = array<i64: 1, 64>}, {pipeline_mode = #tpu.pipeline_mode<synchronous>, transform_indices = @transform_5, window_bounds = array<i64: 64, 10>}, {pipeline_mode = #tpu.pipeline_mode<synchronous>, transform_indices = @transform_6, window_bounds = array<i64: 1, 10>}, {transform_indices = @transform_7, window_bounds = array<i64: 8, 10>}]} {
    %c0 = arith.constant 0 : index
    %c0_0 = arith.constant 0 : index
    %0 = vector.load %arg1[%c0, %c0_0] : memref<8x896xf32, #tpu.memory_space<vmem>>, vector<8x896xf32>
    %c0_1 = arith.constant 0 : index
    %c0_2 = arith.constant 0 : index
    %1 = vector.load %arg2[%c0_1, %c0_2] : memref<896x256xf32, #tpu.memory_space<vmem>>, vector<896x256xf32>
    %cst = arith.constant dense<0.000000e+00> : vector<8x256xf32>
    %2 = tpu.matmul %0, %1, %cst {dimension_numbers = #tpu.dot_dimension_numbers<[1], [0], [0], [1], [0, 0, 1, 1], [], []>} : vector<8x896xf32>, vector<896x256xf32>, vector<8x256xf32> -> vector<8x256xf32>
    %c0_3 = arith.constant 0 : index
    %c0_4 = arith.constant 0 : index
    %3 = vector.load %arg3[%c0_3, %c0_4] : memref<1x256xf32, #tpu.memory_space<vmem>>, vector<1x256xf32>
    %4 = vector.broadcast %3 : vector<1x256xf32> to vector<8x256xf32>
    %5 = arith.addf %2, %4 : vector<8x256xf32>
    %6 = arith.mulf %5, %5 : vector<8x256xf32>
    %c0_5 = arith.constant 0 : index
    %c0_6 = arith.constant 0 : index
    %7 = vector.load %arg4[%c0_5, %c0_6] : memref<256x64xf32, #tpu.memory_space<vmem>>, vector<256x64xf32>
    %cst_7 = arith.constant dense<0.000000e+00> : vector<8x64xf32>
    %8 = tpu.matmul %6, %7, %cst_7 {dimension_numbers = #tpu.dot_dimension_numbers<[1], [0], [0], [1], [0, 0, 1, 1], [], []>} : vector<8x256xf32>, vector<256x64xf32>, vector<8x64xf32> -> vector<8x64xf32>
    %c0_8 = arith.constant 0 : index
    %c0_9 = arith.constant 0 : index
    %9 = vector.load %arg5[%c0_8, %c0_9] : memref<1x64xf32, #tpu.memory_space<vmem>>, vector<1x64xf32>
    %10 = vector.broadcast %9 : vector<1x64xf32> to vector<8x64xf32>
    %11 = arith.addf %8, %10 : vector<8x64xf32>
    %12 = arith.mulf %11, %11 : vector<8x64xf32>
    %c0_10 = arith.constant 0 : index
    %c0_11 = arith.constant 0 : index
    %13 = vector.load %arg6[%c0_10, %c0_11] : memref<64x10xf32, #tpu.memory_space<vmem>>, vector<64x10xf32>
    %cst_12 = arith.constant dense<0.000000e+00> : vector<8x10xf32>
    %14 = tpu.matmul %12, %13, %cst_12 {dimension_numbers = #tpu.dot_dimension_numbers<[1], [0], [0], [1], [0, 0, 1, 1], [], []>} : vector<8x64xf32>, vector<64x10xf32>, vector<8x10xf32> -> vector<8x10xf32>
    %c0_13 = arith.constant 0 : index
    %c0_14 = arith.constant 0 : index
    %15 = vector.load %arg7[%c0_13, %c0_14] : memref<1x10xf32, #tpu.memory_space<vmem>>, vector<1x10xf32>
    %16 = vector.broadcast %15 : vector<1x10xf32> to vector<8x10xf32>
    %17 = arith.addf %14, %16 : vector<8x10xf32>
    %c0_15 = arith.constant 0 : index
    %c0_16 = arith.constant 0 : index
    %18 = vector.load %arg8[%c0_15, %c0_16] : memref<8x10xf32, #tpu.memory_space<vmem>>, vector<8x10xf32>
    tpu.vector_store %arg8[%c0_15, %c0_16], %17 {strides = array<i32>} : memref<8x10xf32, #tpu.memory_space<vmem>>, vector<8x10xf32>,
    return
  }
  func.func @transform_0(%arg0: i32) -> (i32, i32) {
    %c0_i32 = arith.constant 0 : i32
    %c0_i32_0 = arith.constant 0 : i32
    return %arg0, %c0_i32 : i32, i32
  }
  func.func @transform_1(%arg0: i32) -> (i32, i32) {
    %c0_i32 = arith.constant 0 : i32
    %c0_i32_0 = arith.constant 0 : i32
    %c0_i32_1 = arith.constant 0 : i32
    return %c0_i32, %c0_i32_0 : i32, i32
  }
  func.func @transform_2(%arg0: i32) -> (i32, i32) {
    %c0_i32 = arith.constant 0 : i32
    %c0_i32_0 = arith.constant 0 : i32
    %c0_i32_1 = arith.constant 0 : i32
    return %c0_i32, %c0_i32_0 : i32, i32
  }
  func.func @transform_3(%arg0: i32) -> (i32, i32) {
    %c0_i32 = arith.constant 0 : i32
    %c0_i32_0 = arith.constant 0 : i32
    %c0_i32_1 = arith.constant 0 : i32
    return %c0_i32, %c0_i32_0 : i32, i32
  }
  func.func @transform_4(%arg0: i32) -> (i32, i32) {
    %c0_i32 = arith.constant 0 : i32
    %c0_i32_0 = arith.constant 0 : i32
    %c0_i32_1 = arith.constant 0 : i32
    return %c0_i32, %c0_i32_0 : i32, i32
  }
  func.func @transform_5(%arg0: i32) -> (i32, i32) {
    %c0_i32 = arith.constant 0 : i32
    %c0_i32_0 = arith.constant 0 : i32
    %c0_i32_1 = arith.constant 0 : i32
    return %c0_i32, %c0_i32_0 : i32, i32
  }
  func.func @transform_6(%arg0: i32) -> (i32, i32) {
    %c0_i32 = arith.constant 0 : i32
    %c0_i32_0 = arith.constant 0 : i32
    %c0_i32_1 = arith.constant 0 : i32
    return %c0_i32, %c0_i32_0 : i32, i32
  }
  func.func @transform_7(%arg0: i32) -> (i32, i32) {
    %c0_i32 = arith.constant 0 : i32
    %c0_i32_0 = arith.constant 0 : i32
    return %arg0, %c0_i32 : i32, i32
  }
}

</mosaic_0001>

<bundles_post_ra>
// kernel: simple_convnet_forward.1
= control target key start
LH: loop header
LB: loop body
LE: loop exit
PB: predicated region body
PF: predicated region fallthrough
CT: control target
= control target key end

     0   :  { %vm1107_vm0 = vmmov 0   ;;  %vm680_vm1 = vcmask 523264   ;;  %vm754_vm2 = vcmask 80896   ;;  %s1975_s1 = inlined_call_operand.vmem [shape: f32[896,256], index: 1, kind: input, shape index: {}]   ;;  %s1976_s0 = inlined_call_operand.vmem [shape: f32[8,896], index: 0, kind: input, shape index: {}]   ;;  %s1977_s3 = inlined_call_operand.vmem [shape: f32[256,64], index: 3, kind: input, shape index: {}]   ;;  %s1978_s2 = inlined_call_operand.vmem [shape: f32[1,256], index: 2, kind: input, shape index: {}]   ;;  %s1979_s5 = inlined_call_operand.vmem [shape: f32[64,10], index: 5, kind: input, shape index: {}]   ;;  %s1980_s4 = inlined_call_operand.vmem [shape: f32[1,64], index: 4, kind: input, shape index: {}]   ;;  %s1981_s6 = inlined_call_operand.vmem [shape: f32[1,10], index: 6, kind: input, shape index: {}]   ;;  %s1982_s7 = inlined_call_operand.vmem [shape: f32[8,10], index: 7, kind: output, shape index: {}]  }
   0x1   :  { %v98_v0 = vld [vmem:[%s1975_s1 + $0x208] sm:$0xff]  ;;  %v100_v1 = vld [vmem:[%s1975_s1 + $0x218] sm:$0xff]  ;;  %v97_v2 = vld [vmem:[%s1975_s1 + $0x200] sm:$0xff] }
   0x2   :  { %v890_v3 = vpack.c.bf16 %v100_v1, %v98_v0  ;;  %v99_v4 = vld [vmem:[%s1975_s1 + $0x210] sm:$0xff]  ;;  %v102_v5 = vld [vmem:[%s1975_s1 + $0x228] sm:$0xff]  ;;  %v104_v6 = vld [vmem:[%s1975_s1 + $0x238] sm:$0xff] }
   0x3   :  { %v892_v7 = vpack.c.bf16 %v99_v4, %v97_v2  ;;  %v894_v8 = vpack.c.bf16 %v104_v6, %v102_v5  ;;  %v101_v9 = vld [vmem:[%s1975_s1 + $0x220] sm:$0xff]  ;;  %v103_v10 = vld [vmem:[%s1975_s1 + $0x230] sm:$0xff]  ;;  %v106_v11 = vld [vmem:[%s1975_s1 + $0x248] sm:$0xff] }
   0x4   :  { %891 = vmatprep.subr.bf16.mxu0 %v890_v3  ;;  %v108_v12 = vld [vmem:[%s1975_s1 + $0x258] sm:$0xff]  ;;  %v896_v13 = vpack.c.bf16 %v103_v10, %v101_v9  ;;  %v105_v15 = vld [vmem:[%s1975_s1 + $0x240] sm:$0xff]  ;;  %v107_v16 = vld [vmem:[%s1975_s1 + $0x250] sm:$0xff] }
   0x5   :  { %893 = vmatpush1.bf16.msra.mxu0 %v892_v7  ;;  %v898_v14 = vpack.c.bf16 %v108_v12, %v106_v11  ;;  %v110_v17 = vld [vmem:[%s1975_s1 + $0x268] sm:$0xff]  ;;  %v112_v18 = vld [vmem:[%s1975_s1 + $0x278] sm:$0xff]  ;;  %v900_v19 = vpack.c.bf16 %v107_v16, %v105_v15  ;;  %v109_v21 = vld [vmem:[%s1975_s1 + $0x260] sm:$0xff] }
   0x6   :  { %895 = vmatprep.subr.bf16.mxu0 %v894_v8  ;;  %v902_v20 = vpack.c.bf16 %v112_v18, %v110_v17  ;;  %v111_v22 = vld [vmem:[%s1975_s1 + $0x270] sm:$0xff]  ;;  %v114_v23 = vld [vmem:[%s1975_s1 + $0x288] sm:$0xff]  ;;  %v116_v24 = vld [vmem:[%s1975_s1 + $0x298] sm:$0xff] }
   0x7   :  { %v34_v25 = vld [vmem:[%s1975_s1 + $0x8] sm:$0xff]  ;;  %v36_v26 = vld [vmem:[%s1975_s1 + $0x18] sm:$0xff]  ;;  %v904_v27 = vpack.c.bf16 %v111_v22, %v109_v21  ;;  %v113_v28 = vld [vmem:[%s1975_s1 + $0x280] sm:$0xff]  ;;  %v906_v31 = vpack.c.bf16 %v116_v24, %v114_v23 }
   0x8   :  { %v826_v29 = vpack.c.bf16 %v36_v26, %v34_v25  ;;  %v33_v30 = vld [vmem:[%s1975_s1] sm:$0xff]  ;;  %v115_v32 = vld [vmem:[%s1975_s1 + $0x290] sm:$0xff]  ;;  %v118_v33 = vld [vmem:[%s1975_s1 + $0x2a8] sm:$0xff] }
   0x9   :  { %897 = vmatpush1.bf16.msra.mxu0 %v896_v13  ;;  %v35_v34 = vld [vmem:[%s1975_s1 + $0x10] sm:$0xff]  ;;  %v120_v35 = vld [vmem:[%s1975_s1 + $0x2b8] sm:$0xff]  ;;  %v38_v37 = vld [vmem:[%s1975_s1 + $0x28] sm:$0xff]  ;;  %v908_v42 = vpack.c.bf16 %v115_v32, %v113_v28 }
   0xa   :  { %899 = vmatprep.subr.bf16.mxu0 %v898_v14  ;;  %827 = vmatprep.subr.bf16.mxu1 %v826_v29  ;;  %v828_v36 = vpack.c.bf16 %v35_v34, %v33_v30  ;;  %v40_v38 = vld [vmem:[%s1975_s1 + $0x38] sm:$0xff]  ;;  %v37_v40 = vld [vmem:[%s1975_s1 + $0x20] sm:$0xff]  ;;  %v39_v41 = vld [vmem:[%s1975_s1 + $0x30] sm:$0xff]  ;;  %v910_v46 = vpack.c.bf16 %v120_v35, %v118_v33 }
   0xb   :  { %v830_v39 = vpack.c.bf16 %v40_v38, %v38_v37  ;;  %v117_v43 = vld [vmem:[%s1975_s1 + $0x2a0] sm:$0xff]  ;;  %v832_v44 = vpack.c.bf16 %v39_v41, %v37_v40  ;;  %v42_v45 = vld [vmem:[%s1975_s1 + $0x48] sm:$0xff]  ;;  %v119_v47 = vld [vmem:[%s1975_s1 + $0x2b0] sm:$0xff] }
   0xc   :  { %829 = vmatpush1.bf16.msra.mxu1 %v828_v36  ;;  %v122_v48 = vld [vmem:[%s1975_s1 + $0x2c8] sm:$0xff]  ;;  %v44_v49 = vld [vmem:[%s1975_s1 + $0x58] sm:$0xff]  ;;  %v41_v52 = vld [vmem:[%s1975_s1 + $0x40] sm:$0xff]  ;;  %v912_v56 = vpack.c.bf16 %v119_v47, %v117_v43 }
   0xd   :  { %901 = vmatpush1.bf16.msra.mxu0 %v900_v19  ;;  %831 = vmatprep.subr.bf16.mxu1 %v830_v39  ;;  %v124_v50 = vld [vmem:[%s1975_s1 + $0x2d8] sm:$0xff]  ;;  %v834_v51 = vpack.c.bf16 %v44_v49, %v42_v45  ;;  %v43_v53 = vld [vmem:[%s1975_s1 + $0x50] sm:$0xff]  ;;  %v46_v54 = vld [vmem:[%s1975_s1 + $0x68] sm:$0xff] }
   0xe   :  { %903 = vmatprep.subr.bf16.mxu0 %v902_v20  ;;  %v48_v55 = vld [vmem:[%s1975_s1 + $0x78] sm:$0xff]  ;;  %v121_v57 = vld [vmem:[%s1975_s1 + $0x2c0] sm:$0xff]  ;;  %v123_v58 = vld [vmem:[%s1975_s1 + $0x2d0] sm:$0xff]  ;;  %v836_v59 = vpack.c.bf16 %v43_v53, %v41_v52  ;;  %v914_v60 = vpack.c.bf16 %v124_v50, %v122_v48 }
   0xf   :  { %v126_v61 = vld [vmem:[%s1975_s1 + $0x2e8] sm:$0xff]  ;;  %v838_v62 = vpack.c.bf16 %v48_v55, %v46_v54  ;;  %v45_v63 = vld [vmem:[%s1975_s1 + $0x60] sm:$0xff]  ;;  %v47_v0 = vld [vmem:[%s1975_s1 + $0x70] sm:$0xff]  ;;  %v916_v4 = vpack.c.bf16 %v123_v58, %v121_v57 }
  0x10   :  { %833 = vmatpush1.bf16.msra.mxu1 %v832_v44  ;;  %v128_v1 = vld [vmem:[%s1975_s1 + $0x2f8] sm:$0xff]  ;;  %v50_v2 = vld [vmem:[%s1975_s1 + $0x88] sm:$0xff]  ;;  %v125_v5 = vld [vmem:[%s1975_s1 + $0x2e0] sm:$0xff]  ;;  %v840_v7 = vpack.c.bf16 %v47_v0, %v45_v63 }
  0x11   :  { %905 = vmatpush1.bf16.msra.mxu0 %v904_v27  ;;  %835 = vmatprep.subr.bf16.mxu1 %v834_v51  ;;  %v52_v3 = vld [vmem:[%s1975_s1 + $0x98] sm:$0xff]  ;;  %v127_v6 = vld [vmem:[%s1975_s1 + $0x2f0] sm:$0xff]  ;;  %v918_v8 = vpack.c.bf16 %v128_v1, %v126_v61  ;;  %v130_v9 = vld [vmem:[%s1975_s1 + $0x308] sm:$0xff] }
  0x12   :  { %907 = vmatprep.subr.bf16.mxu0 %v906_v31  ;;  %v842_v10 = vpack.c.bf16 %v52_v3, %v50_v2  ;;  %v49_v11 = vld [vmem:[%s1975_s1 + $0x80] sm:$0xff]  ;;  %v51_v12 = vld [vmem:[%s1975_s1 + $0x90] sm:$0xff]  ;;  %v132_v13 = vld [vmem:[%s1975_s1 + $0x318] sm:$0xff]  ;;  %v920_v16 = vpack.c.bf16 %v127_v6, %v125_v5 }
  0x13   :  { %v54_v14 = vld [vmem:[%s1975_s1 + $0xa8] sm:$0xff]  ;;  %v56_v15 = vld [vmem:[%s1975_s1 + $0xb8] sm:$0xff]  ;;  %v129_v17 = vld [vmem:[%s1975_s1 + $0x300] sm:$0xff]  ;;  %v844_v19 = vpack.c.bf16 %v51_v12, %v49_v11  ;;  %v922_v20 = vpack.c.bf16 %v132_v13, %v130_v9 }
  0x14   :  { %837 = vmatpush1.bf16.msra.mxu1 %v836_v59  ;;  %v131_v18 = vld [vmem:[%s1975_s1 + $0x310] sm:$0xff]  ;;  %v134_v21 = vld [vmem:[%s1975_s1 + $0x328] sm:$0xff]  ;;  %v846_v22 = vpack.c.bf16 %v56_v15, %v54_v14  ;;  %v53_v23 = vld [vmem:[%s1975_s1 + $0xa0] sm:$0xff] }
  0x15   :  { %909 = vmatpush1.bf16.msra.mxu0 %v908_v42  ;;  %839 = vmatprep.subr.bf16.mxu1 %v838_v62  ;;  %v55_v24 = vld [vmem:[%s1975_s1 + $0xb0] sm:$0xff]  ;;  %v136_v25 = vld [vmem:[%s1975_s1 + $0x338] sm:$0xff]  ;;  %v58_v26 = vld [vmem:[%s1975_s1 + $0xc8] sm:$0xff]  ;;  %v924_v28 = vpack.c.bf16 %v131_v18, %v129_v17 }
  0x16   :  { %911 = vmatprep.subr.bf16.mxu0 %v910_v46  ;;  %v60_v27 = vld [vmem:[%s1975_s1 + $0xd8] sm:$0xff]  ;;  %v133_v29 = vld [vmem:[%s1975_s1 + $0x320] sm:$0xff]  ;;  %v135_v30 = vld [vmem:[%s1975_s1 + $0x330] sm:$0xff]  ;;  %v848_v31 = vpack.c.bf16 %v55_v24, %v53_v23  ;;  %v926_v33 = vpack.c.bf16 %v136_v25, %v134_v21 }
  0x17   :  { %v29_v32 = vld [vmem:[%s1976_s0 + $0x18] sm:$0xff]  ;;  %v138_v34 = vld [vmem:[%s1975_s1 + $0x348] sm:$0xff]  ;;  %v850_v35 = vpack.c.bf16 %v60_v27, %v58_v26  ;;  %v57_v36 = vld [vmem:[%s1975_s1 + $0xc0] sm:$0xff]  ;;  %v928_v41 = vpack.c.bf16 %v135_v30, %v133_v29 }
  0x18   :  { %841 = vmatpush1.bf16.msra.mxu1 %v840_v7  ;;  %v59_v37 = vld [vmem:[%s1975_s1 + $0xd0] sm:$0xff]  ;;  %v140_v38 = vld [vmem:[%s1975_s1 + $0x358] sm:$0xff]  ;;  %v62_v39 = vld [vmem:[%s1975_s1 + $0xe8] sm:$0xff]  ;;  %404 = vmatprep.mubr.f32.mxu0 %v29_v32 }
  0x19   :  { %913 = vmatpush1.bf16.msra.mxu0 %v912_v56  ;;  %843 = vmatprep.subr.bf16.mxu1 %v842_v10  ;;  %v64_v40 = vld [vmem:[%s1975_s1 + $0xf8] sm:$0xff]  ;;  %v137_v42 = vld [vmem:[%s1975_s1 + $0x340] sm:$0xff]  ;;  %v139_v43 = vld [vmem:[%s1975_s1 + $0x350] sm:$0xff]  ;;  %v852_v44 = vpack.c.bf16 %v59_v37, %v57_v36  ;;  %v930_v45 = vpack.c.bf16 %v140_v38, %v138_v34 }
  0x1a   :  { %915 = vmatprep.subr.bf16.mxu0 %v914_v60  ;;  %v142_v46 = vld [vmem:[%s1975_s1 + $0x368] sm:$0xff]  ;;  %v854_v47 = vpack.c.bf16 %v64_v40, %v62_v39  ;;  %v61_v48 = vld [vmem:[%s1975_s1 + $0xe0] sm:$0xff]  ;;  %v63_v49 = vld [vmem:[%s1975_s1 + $0xf0] sm:$0xff]  ;;  %v932_v53 = vpack.c.bf16 %v139_v43, %v137_v42 }
  0x1b   :  { %v144_v50 = vld [vmem:[%s1975_s1 + $0x378] sm:$0xff]  ;;  %v66_v51 = vld [vmem:[%s1975_s1 + $0x108] sm:$0xff]  ;;  %v141_v54 = vld [vmem:[%s1975_s1 + $0x360] sm:$0xff]  ;;  %v856_v56 = vpack.c.bf16 %v63_v49, %v61_v48 }
  0x1c   :  { %845 = vmatpush1.bf16.msra.mxu1 %v844_v19  ;;  %v68_v52 = vld [vmem:[%s1975_s1 + $0x118] sm:$0xff]  ;;  %v143_v55 = vld [vmem:[%s1975_s1 + $0x370] sm:$0xff]  ;;  %v934_v57 = vpack.c.bf16 %v144_v50, %v142_v46  ;;  %v146_v58 = vld [vmem:[%s1975_s1 + $0x388] sm:$0xff] }
  0x1d   :  { %917 = vmatpush1.bf16.msra.mxu0 %v916_v4  ;;  %847 = vmatprep.subr.bf16.mxu1 %v846_v22  ;;  %v858_v59 = vpack.c.bf16 %v68_v52, %v66_v51  ;;  %v65_v60 = vld [vmem:[%s1975_s1 + $0x100] sm:$0xff]  ;;  %v67_v61 = vld [vmem:[%s1975_s1 + $0x110] sm:$0xff]  ;;  %v148_v62 = vld [vmem:[%s1975_s1 + $0x398] sm:$0xff]  ;;  %v936_v1 = vpack.c.bf16 %v143_v55, %v141_v54 }
  0x1e   :  { %919 = vmatprep.subr.bf16.mxu0 %v918_v8  ;;  %v70_v63 = vld [vmem:[%s1975_s1 + $0x128] sm:$0xff]  ;;  %v72_v0 = vld [vmem:[%s1975_s1 + $0x138] sm:$0xff]  ;;  %v145_v2 = vld [vmem:[%s1975_s1 + $0x380] sm:$0xff]  ;;  %v860_v4 = vpack.c.bf16 %v67_v61, %v65_v60  ;;  %v938_v5 = vpack.c.bf16 %v148_v62, %v146_v58 }
  0x1f   :  { %v147_v3 = vld [vmem:[%s1975_s1 + $0x390] sm:$0xff]  ;;  %v150_v6 = vld [vmem:[%s1975_s1 + $0x3a8] sm:$0xff]  ;;  %v862_v7 = vpack.c.bf16 %v72_v0, %v70_v63  ;;  %v69_v8 = vld [vmem:[%s1975_s1 + $0x120] sm:$0xff] }
  0x20   :  { %849 = vmatpush1.bf16.msra.mxu1 %v848_v31  ;;  %v71_v9 = vld [vmem:[%s1975_s1 + $0x130] sm:$0xff]  ;;  %v152_v10 = vld [vmem:[%s1975_s1 + $0x3b8] sm:$0xff]  ;;  %v74_v11 = vld [vmem:[%s1975_s1 + $0x148] sm:$0xff]  ;;  %v940_v13 = vpack.c.bf16 %v147_v3, %v145_v2 }
  0x21   :  { %921 = vmatpush1.bf16.msra.mxu0 %v920_v16  ;;  %851 = vmatprep.subr.bf16.mxu1 %v850_v35  ;;  %v76_v12 = vld [vmem:[%s1975_s1 + $0x158] sm:$0xff]  ;;  %v149_v14 = vld [vmem:[%s1975_s1 + $0x3a0] sm:$0xff]  ;;  %v151_v15 = vld [vmem:[%s1975_s1 + $0x3b0] sm:$0xff]  ;;  %v864_v16 = vpack.c.bf16 %v71_v9, %v69_v8  ;;  %v942_v17 = vpack.c.bf16 %v152_v10, %v150_v6 }
  0x22   :  { %923 = vmatprep.subr.bf16.mxu0 %v922_v20  ;;  %v154_v18 = vld [vmem:[%s1975_s1 + $0x3c8] sm:$0xff]  ;;  %v866_v19 = vpack.c.bf16 %v76_v12, %v74_v11  ;;  %v73_v20 = vld [vmem:[%s1975_s1 + $0x140] sm:$0xff]  ;;  %v75_v21 = vld [vmem:[%s1975_s1 + $0x150] sm:$0xff]  ;;  %v944_v25 = vpack.c.bf16 %v151_v15, %v149_v14 }
  0x23   :  { %v156_v22 = vld [vmem:[%s1975_s1 + $0x3d8] sm:$0xff]  ;;  %v78_v23 = vld [vmem:[%s1975_s1 + $0x168] sm:$0xff]  ;;  %v153_v26 = vld [vmem:[%s1975_s1 + $0x3c0] sm:$0xff]  ;;  %v868_v29 = vpack.c.bf16 %v75_v21, %v73_v20 }
  0x24   :  { %853 = vmatpush1.bf16.msra.mxu1 %v852_v44  ;;  %v80_v24 = vld [vmem:[%s1975_s1 + $0x178] sm:$0xff]  ;;  %v155_v27 = vld [vmem:[%s1975_s1 + $0x3d0] sm:$0xff]  ;;  %v946_v30 = vpack.c.bf16 %v156_v22, %v154_v18  ;;  %v82_v35 = vld [vmem:[%s1975_s1 + $0x188] sm:$0xff] }
  0x25   :  { %925 = vmatpush1.bf16.msra.mxu0 %v924_v28  ;;  %855 = vmatprep.subr.bf16.mxu1 %v854_v47  ;;  %v158_v28 = vld [vmem:[%s1975_s1 + $0x3e8] sm:$0xff]  ;;  %v160_v31 = vld [vmem:[%s1975_s1 + $0x3f8] sm:$0xff]  ;;  %v870_v32 = vpack.c.bf16 %v80_v24, %v78_v23  ;;  %v79_v34 = vld [vmem:[%s1975_s1 + $0x170] sm:$0xff]  ;;  %v948_v38 = vpack.c.bf16 %v155_v27, %v153_v26 }
  0x26   :  { %927 = vmatprep.subr.bf16.mxu0 %v926_v33  ;;  %v77_v33 = vld [vmem:[%s1975_s1 + $0x160] sm:$0xff]  ;;  %v84_v36 = vld [vmem:[%s1975_s1 + $0x198] sm:$0xff]  ;;  %v27_v37 = vld [vmem:[%s1976_s0 + $0x8] sm:$0xff]  ;;  %v950_v42 = vpack.c.bf16 %v160_v31, %v158_v28 }
  0x27   :  { %333 = vmatprep.mubr.f32.mxu1 %v27_v37  ;;  %v157_v39 = vld [vmem:[%s1975_s1 + $0x3e0] sm:$0xff]  ;;  %v159_v40 = vld [vmem:[%s1975_s1 + $0x3f0] sm:$0xff]  ;;  %v162_v43 = vld [vmem:[%s1975_s1 + $0x408] sm:$0xff]  ;;  %v874_v44 = vpack.c.bf16 %v84_v36, %v82_v35 }
  0x28   :  { %857 = vmatpush1.bf16.msra.mxu1 %v856_v56  ;;  %v83_v46 = vld [vmem:[%s1975_s1 + $0x190] sm:$0xff]  ;;  %v164_v47 = vld [vmem:[%s1975_s1 + $0x418] sm:$0xff]  ;;  %v86_v48 = vld [vmem:[%s1975_s1 + $0x1a8] sm:$0xff]  ;;  %v952_v50 = vpack.c.bf16 %v159_v40, %v157_v39 }
  0x29   :  { %929 = vmatpush1.bf16.msra.mxu0 %v928_v41  ;;  %859 = vmatprep.subr.bf16.mxu1 %v858_v59  ;;  %v872_v41 = vpack.c.bf16 %v79_v34, %v77_v33  ;;  %v88_v49 = vld [vmem:[%s1975_s1 + $0x1b8] sm:$0xff]  ;;  %v161_v51 = vld [vmem:[%s1975_s1 + $0x400] sm:$0xff]  ;;  %v163_v52 = vld [vmem:[%s1975_s1 + $0x410] sm:$0xff]  ;;  %v954_v54 = vpack.c.bf16 %v164_v47, %v162_v43 }
  0x2a   :  { %931 = vmatprep.subr.bf16.mxu0 %v930_v45  ;;  %v81_v45 = vld [vmem:[%s1975_s1 + $0x180] sm:$0xff]  ;;  %v166_v55 = vld [vmem:[%s1975_s1 + $0x428] sm:$0xff]  ;;  %v878_v56 = vpack.c.bf16 %v88_v49, %v86_v48  ;;  %v87_v58 = vld [vmem:[%s1975_s1 + $0x1b0] sm:$0xff]  ;;  %v956_v63 = vpack.c.bf16 %v163_v52, %v161_v51 }
  0x2b   :  { %v168_v59 = vld [vmem:[%s1975_s1 + $0x438] sm:$0xff]  ;;  %v90_v60 = vld [vmem:[%s1975_s1 + $0x1c8] sm:$0xff]  ;;  %v28_v62 = vld [vmem:[%s1976_s0 + $0x10] sm:$0xff] }
  0x2c   :  { %861 = vmatpush1.bf16.msra.mxu1 %v860_v4  ;;  %v92_v61 = vld [vmem:[%s1975_s1 + $0x1d8] sm:$0xff]  ;;  %v165_v0 = vld [vmem:[%s1975_s1 + $0x420] sm:$0xff]  ;;  %v958_v3 = vpack.c.bf16 %v168_v59, %v166_v55  ;;  %v170_v4 = vld [vmem:[%s1975_s1 + $0x448] sm:$0xff] }
  0x2d   :  { %933 = vmatpush1.bf16.msra.mxu0 %v932_v53  ;;  %863 = vmatprep.subr.bf16.mxu1 %v862_v7  ;;  %v876_v53 = vpack.c.bf16 %v83_v46, %v81_v45  ;;  %v89_v6 = vld [vmem:[%s1975_s1 + $0x1c0] sm:$0xff]  ;;  %v91_v7 = vld [vmem:[%s1975_s1 + $0x1d0] sm:$0xff]  ;;  %v172_v8 = vld [vmem:[%s1975_s1 + $0x458] sm:$0xff] }
  0x2e   :  { %935 = vmatprep.subr.bf16.mxu0 %v934_v57  ;;  %v85_v57 = vld [vmem:[%s1975_s1 + $0x1a0] sm:$0xff]  ;;  %v94_v9 = vld [vmem:[%s1975_s1 + $0x1e8] sm:$0xff]  ;;  %v96_v10 = vld [vmem:[%s1975_s1 + $0x1f8] sm:$0xff]  ;;  %v884_v14 = vpack.c.bf16 %v91_v7, %v89_v6  ;;  %v962_v15 = vpack.c.bf16 %v172_v8, %v170_v4 }
  0x2f   :  { %v880_v2 = vpack.c.bf16 %v87_v58, %v85_v57  ;;  %v169_v12 = vld [vmem:[%s1975_s1 + $0x440] sm:$0xff]  ;;  %v176_v20 = vld [vmem:[%s1975_s1 + $0x478] sm:$0xff]  ;;  %v226_v21 = vld [vmem:[%s1975_s1 + $0x608] sm:$0xff] }
  0x30   :  { %865 = vmatpush1.bf16.msra.mxu1 %v864_v16  ;;  %v174_v16 = vld [vmem:[%s1975_s1 + $0x468] sm:$0xff]  ;;  %v93_v18 = vld [vmem:[%s1975_s1 + $0x1e0] sm:$0xff]  ;;  %v228_v22 = vld [vmem:[%s1975_s1 + $0x618] sm:$0xff] }
  0x31   :  { %937 = vmatpush1.bf16.msra.mxu0 %v936_v1  ;;  %867 = vmatprep.subr.bf16.mxu1 %v866_v19  ;;  %v167_v1 = vld [vmem:[%s1975_s1 + $0x430] sm:$0xff]  ;;  %v173_v24 = vld [vmem:[%s1975_s1 + $0x460] sm:$0xff]  ;;  %v966_v27 = vpack.c.bf16 %v176_v20, %v174_v16  ;;  %v178_v28 = vld [vmem:[%s1975_s1 + $0x488] sm:$0xff] }
  0x32   :  { %939 = vmatprep.subr.bf16.mxu0 %v938_v5  ;;  %v882_v5 = vpack.c.bf16 %v92_v61, %v90_v60  ;;  %v960_v11 = vpack.c.bf16 %v167_v1, %v165_v0  ;;  %v95_v19 = vld [vmem:[%s1975_s1 + $0x1f0] sm:$0xff]  ;;  %v230_v33 = vld [vmem:[%s1975_s1 + $0x628] sm:$0xff]  ;;  %v232_v34 = vld [vmem:[%s1975_s1 + $0x638] sm:$0xff]  ;;  %v1105_v61 = vmov 0.0  }
  0x33   :  { %v888_v26 = vpack.c.bf16 %v95_v19, %v93_v18  ;;  %v227_v31 = vld [vmem:[%s1975_s1 + $0x610] sm:$0xff]  ;;  %v177_v35 = vld [vmem:[%s1975_s1 + $0x480] sm:$0xff]  ;;  %v31_v40 = vld [vmem:[%s1976_s0 + $0x28] sm:$0xff]  ;;  %v1022_v43 = vpack.c.bf16 %v232_v34, %v230_v33 }
  0x34   :  { %869 = vmatpush1.bf16.msra.mxu1 %v868_v29  ;;  %v1018_v29 = vpack.c.bf16 %v228_v22, %v226_v21  ;;  %v179_v37 = vld [vmem:[%s1975_s1 + $0x490] sm:$0xff]  ;;  %v184_v46 = vld [vmem:[%s1975_s1 + $0x4b8] sm:$0xff]  ;;  %v234_v47 = vld [vmem:[%s1975_s1 + $0x648] sm:$0xff] }
  0x35   :  { %941 = vmatpush1.bf16.msra.mxu0 %v940_v13  ;;  %871 = vmatprep.subr.bf16.mxu1 %v870_v32  ;;  %v171_v13 = vld [vmem:[%s1975_s1 + $0x450] sm:$0xff]  ;;  %v180_v32 = vld [vmem:[%s1975_s1 + $0x498] sm:$0xff]  ;;  %v972_v49 = vpack.c.bf16 %v179_v37, %v177_v35  ;;  %v238_v59 = vld [vmem:[%s1975_s1 + $0x668] sm:$0xff] }
  0x36   :  { %943 = vmatprep.subr.bf16.mxu0 %v942_v17  ;;  %v886_v17 = vpack.c.bf16 %v96_v10, %v94_v9  ;;  %v964_v23 = vpack.c.bf16 %v171_v13, %v169_v12  ;;  %v231_v45 = vld [vmem:[%s1975_s1 + $0x630] sm:$0xff]  ;;  %v236_v48 = vld [vmem:[%s1975_s1 + $0x658] sm:$0xff]  ;;  %v242_v8 = vld [vmem:[%s1975_s1 + $0x688] sm:$0xff] }
  0x37   :  { %v183_v51 = vld [vmem:[%s1975_s1 + $0x4b0] sm:$0xff]  ;;  %v1026_v55 = vpack.c.bf16 %v236_v48, %v234_v47  ;;  %v188_v58 = vld [vmem:[%s1975_s1 + $0x4d8] sm:$0xff]  ;;  %v246_v20 = vld [vmem:[%s1975_s1 + $0x6a8] sm:$0xff] }
  0x38   :  { %873 = vmatpush1.bf16.msra.mxu1 %v872_v41  ;;  %v970_v41 = vpack.c.bf16 %v180_v32, %v178_v28  ;;  %v235_v57 = vld [vmem:[%s1975_s1 + $0x650] sm:$0xff]  ;;  %v240_v60 = vld [vmem:[%s1975_s1 + $0x678] sm:$0xff]  ;;  %v250_v32 = vld [vmem:[%s1975_s1 + $0x6c8] sm:$0xff] }
  0x39   :  { %945 = vmatpush1.bf16.msra.mxu0 %v944_v25  ;;  %875 = vmatprep.subr.bf16.mxu1 %v874_v44  ;;  %v175_v25 = vld [vmem:[%s1975_s1 + $0x470] sm:$0xff]  ;;  %v229_v44 = vld [vmem:[%s1975_s1 + $0x620] sm:$0xff]  ;;  %v1030_v4 = vpack.c.bf16 %v240_v60, %v238_v59  ;;  %v192_v7 = vld [vmem:[%s1975_s1 + $0x4f8] sm:$0xff] }
  0x3a   :  { %947 = vmatprep.subr.bf16.mxu0 %v946_v30  ;;  %v225_v30 = vld [vmem:[%s1975_s1 + $0x600] sm:$0xff]  ;;  %v968_v36 = vpack.c.bf16 %v175_v25, %v173_v24  ;;  %v1024_v52 = vpack.c.bf16 %v231_v45, %v229_v44  ;;  %v187_v0 = vld [vmem:[%s1975_s1 + $0x4d0] sm:$0xff]  ;;  %v244_v9 = vld [vmem:[%s1975_s1 + $0x698] sm:$0xff] }
  0x3b   :  { %v1020_v39 = vpack.c.bf16 %v227_v31, %v225_v30  ;;  %v239_v6 = vld [vmem:[%s1975_s1 + $0x670] sm:$0xff]  ;;  %v1034_v16 = vpack.c.bf16 %v244_v9, %v242_v8  ;;  %v196_v19 = vld [vmem:[%s1975_s1 + $0x518] sm:$0xff]  ;;  %v197_v35 = vld [vmem:[%s1975_s1 + $0x520] sm:$0xff] }
  0x3c   :  { %877 = vmatpush1.bf16.msra.mxu1 %v876_v53  ;;  %v191_v12 = vld [vmem:[%s1975_s1 + $0x4f0] sm:$0xff]  ;;  %v248_v21 = vld [vmem:[%s1975_s1 + $0x6b8] sm:$0xff]  ;;  %v254_v44 = vld [vmem:[%s1975_s1 + $0x6e8] sm:$0xff] }
  0x3d   :  { %949 = vmatpush1.bf16.msra.mxu0 %v948_v38  ;;  %879 = vmatprep.subr.bf16.mxu1 %v878_v56  ;;  %v26_v38 = vld [vmem:[%s1976_s0] sm:$0xff]  ;;  %v243_v18 = vld [vmem:[%s1975_s1 + $0x690] sm:$0xff]  ;;  %v1038_v28 = vpack.c.bf16 %v248_v21, %v246_v20  ;;  %v200_v31 = vld [vmem:[%s1975_s1 + $0x538] sm:$0xff] }
  0x3e   :  { %951 = vmatprep.subr.bf16.mxu0 %v950_v42  ;;  %v182_v42 = vld [vmem:[%s1975_s1 + $0x4a8] sm:$0xff]  ;;  %v233_v56 = vld [vmem:[%s1975_s1 + $0x640] sm:$0xff]  ;;  %v195_v24 = vld [vmem:[%s1975_s1 + $0x510] sm:$0xff] }
  0x3f   :  { %v974_v53 = vpack.c.bf16 %v184_v46, %v182_v42  ;;  %v1028_v1 = vpack.c.bf16 %v235_v57, %v233_v56  ;;  %v247_v30 = vld [vmem:[%s1975_s1 + $0x6b0] sm:$0xff]  ;;  %v252_v33 = vld [vmem:[%s1975_s1 + $0x6d8] sm:$0xff]  ;;  %v201_v47 = vld [vmem:[%s1975_s1 + $0x540] sm:$0xff] }
  0x40   :  { %881 = vmatpush1.bf16.msra.mxu1 %v880_v2  ;;  %v251_v42 = vld [vmem:[%s1975_s1 + $0x6d0] sm:$0xff]  ;;  %v256_v45 = vld [vmem:[%s1975_s1 + $0x6f8] sm:$0xff]  ;;  %v205_v59 = vld [vmem:[%s1975_s1 + $0x560] sm:$0xff] }
  0x41   :  { %953 = vmatpush1.bf16.msra.mxu0 %v952_v50  ;;  %883 = vmatprep.subr.bf16.mxu1 %v882_v5  ;;  %v181_v50 = vld [vmem:[%s1975_s1 + $0x4a0] sm:$0xff]  ;;  %v207_v60 = vld [vmem:[%s1975_s1 + $0x570] sm:$0xff] }
  0x42   :  { %955 = vmatprep.subr.bf16.mxu0 %v954_v54  ;;  %v186_v54 = vld [vmem:[%s1975_s1 + $0x4c8] sm:$0xff]  ;;  %v237_v5 = vld [vmem:[%s1975_s1 + $0x660] sm:$0xff] }
  0x43   :  { %v978_v2 = vpack.c.bf16 %v188_v58, %v186_v54  ;;  %v1032_v13 = vpack.c.bf16 %v239_v6, %v237_v5  ;;  %v206_v54 = vld [vmem:[%s1975_s1 + $0x568] sm:$0xff]  ;;  %v216_v6 = vld [vmem:[%s1975_s1 + $0x5b8] sm:$0xff]  ;;  %v213_v9 = vld [vmem:[%s1975_s1 + $0x5a0] sm:$0xff] }
  0x44   :  { %405 = vmatmul.mubr.f32.vlgmr.msra.gmra.mrb[0].mxu0 %v28_v62  ;;  %885 = vmatpush1.bf16.msra.mxu1 %v884_v14  ;;  %v976_v62 = vpack.c.bf16 %v183_v51, %v181_v50  ;;  %v203_v50 = vld [vmem:[%s1975_s1 + $0x550] sm:$0xff]  ;;  %v1046_v51 = vpack.c.bf16 %v256_v45, %v254_v44  ;;  %v214_v5 = vld [vmem:[%s1975_s1 + $0x5a8] sm:$0xff]  ;;  %v221_v21 = vld [vmem:[%s1975_s1 + $0x5e0] sm:$0xff] }
  0x45   :  { %957 = vmatpush1.bf16.msra.mxu0 %v956_v63  ;;  %887 = vmatprep.subr.bf16.mxu1 %v886_v17  ;;  %v185_v63 = vld [vmem:[%s1975_s1 + $0x4c0] sm:$0xff]  ;;  %v996_v56 = vpack.c.bf16 %v203_v50, %v201_v47  ;;  %v1006_v8 = vpack.c.bf16 %v216_v6, %v214_v5  ;;  %v562_v47 = vld [vmem:[%s1977_s3 + $0x38] sm:$0xff] }
  0x46   :  { %959 = vmatprep.subr.bf16.mxu0 %v958_v3  ;;  %475 = vmatprep.mubr.f32.mxu0 %v31_v40  ;;  %v190_v3 = vld [vmem:[%s1975_s1 + $0x4e8] sm:$0xff]  ;;  %v980_v10 = vpack.c.bf16 %v187_v0, %v185_v63  ;;  %v241_v17 = vld [vmem:[%s1975_s1 + $0x680] sm:$0xff]  ;;  %v1042_v40 = vpack.c.bf16 %v252_v33, %v250_v32  ;;  %v212_v63 = vld [vmem:[%s1975_s1 + $0x598] sm:$0xff]  ;;  %v1000_v0 = vpack.c.bf16 %v207_v60, %v205_v59 }
  0x47   :  { %v982_v14 = vpack.c.bf16 %v192_v7, %v190_v3  ;;  %v1036_v25 = vpack.c.bf16 %v243_v18, %v241_v17  ;;  %v209_v3 = vld [vmem:[%s1975_s1 + $0x580] sm:$0xff]  ;;  %v222_v17 = vld [vmem:[%s1975_s1 + $0x5e8] sm:$0xff]  ;;  %v224_v18 = vld [vmem:[%s1975_s1 + $0x5f8] sm:$0xff] }
  0x48   :  { %889 = vmatpush1.bf16.msra.mxu1 %v888_v26  ;;  %v1014_v20 = vpack.c.bf16 %v224_v18, %v222_v17  ;;  %v566_v59 = vld [vmem:[%s1977_s3 + $0x58] sm:$0xff]  ;;  %v257_v18 = vld [vmem:[%s1978_s2] sm:$0x3] }
  0x49   :  { %961 = vmatpush1.bf16.msra.mxu0 %v960_v11  ;;  %1019 = vmatprep.subr.bf16.mxu1 %v1018_v29  ;;  %v189_v11 = vld [vmem:[%s1975_s1 + $0x4e0] sm:$0xff]  ;;  %v586_v5 = vld [vmem:[%s1977_s3 + $0xf8] sm:$0xff] }
  0x4a   :  { %963 = vmatprep.subr.bf16.mxu0 %v962_v15  ;;  %v194_v15 = vld [vmem:[%s1975_s1 + $0x508] sm:$0xff]  ;;  %v984_v22 = vpack.c.bf16 %v191_v12, %v189_v11  ;;  %v245_v29 = vld [vmem:[%s1975_s1 + $0x6a0] sm:$0xff]  ;;  %v220_v12 = vld [vmem:[%s1975_s1 + $0x5d8] sm:$0xff] }
  0x4b   :  { %334 = vmatmul.mubr.f32.vlgmr.msra.gmra.mrb[0].mxu1 %v26_v38  ;;  %v986_v26 = vpack.c.bf16 %v196_v19, %v194_v15  ;;  %v1040_v37 = vpack.c.bf16 %v247_v30, %v245_v29  ;;  %v218_v11 = vld [vmem:[%s1975_s1 + $0x5c8] sm:$0xff]  ;;  %v217_v15 = vld [vmem:[%s1975_s1 + $0x5c0] sm:$0xff]  ;;  %v573_v30 = vld [vmem:[%s1977_s3 + $0x90] sm:$0xff] }
  0x4c   :  { %1021 = vmatpush1.bf16.msra.mxu1 %v1020_v39  ;;  %546 = vmatprep.mubr.f32.mxu1 %v1105_v61  ;;  %v202_v39 = vld [vmem:[%s1975_s1 + $0x548] sm:$0xff] }
  0x4d   :  { %965 = vmatpush1.bf16.msra.mxu0 %v964_v23  ;;  %1023 = vmatprep.subr.bf16.mxu1 %v1022_v43  ;;  %v193_v23 = vld [vmem:[%s1975_s1 + $0x500] sm:$0xff]  ;;  %v204_v43 = vld [vmem:[%s1975_s1 + $0x558] sm:$0xff]  ;;  %v556_v29 = vld [vmem:[%s1977_s3 + $0x8] sm:$0xff] }
  0x4e   :  { %967 = vmatprep.subr.bf16.mxu0 %v966_v27  ;;  %v198_v27 = vld [vmem:[%s1975_s1 + $0x528] sm:$0xff]  ;;  %v988_v34 = vpack.c.bf16 %v195_v24, %v193_v23  ;;  %v30_v24 = vld [vmem:[%s1976_s0 + $0x20] sm:$0xff] }
  0x4f   :  { %v990_v38 = vpack.c.bf16 %v200_v31, %v198_v27  ;;  %v555_v27 = vld [vmem:[%s1977_s3] sm:$0xff]  ;;  %v574_v31 = vld [vmem:[%s1977_s3 + $0x98] sm:$0xff] }
  0x50   :  { %1025 = vmatpush1.bf16.msra.mxu1 %v1024_v52  ;;  %v253_v52 = vld [vmem:[%s1975_s1 + $0x6e0] sm:$0xff]  ;;  %v1052_v32 = vpack.c.bf16 %v556_v29, %v555_v27  ;;  %v1054_v33 = vpack.c.bf16 %v574_v31, %v573_v30  ;;  %v666_v30 = vld [vmem:[%s1979_s5 + $0x8] sm:$0xff] }
  0x51   :  { %969 = vmatpush1.bf16.msra.mxu0 %v968_v36  ;;  %1027 = vmatprep.subr.bf16.mxu1 %v1026_v55  ;;  %v199_v36 = vld [vmem:[%s1975_s1 + $0x530] sm:$0xff]  ;;  %v208_v55 = vld [vmem:[%s1975_s1 + $0x578] sm:$0xff]  ;;  %v665_v29 = vld [vmem:[%s1979_s5] sm:$0xff] }
  0x52   :  { %971 = vmatprep.subr.bf16.mxu0 %v970_v41  ;;  %v249_v41 = vld [vmem:[%s1975_s1 + $0x6c0] sm:$0xff]  ;;  %v992_v46 = vpack.c.bf16 %v199_v36, %v197_v35  ;;  %v998_v58 = vpack.c.bf16 %v208_v55, %v206_v54  ;;  %v558_v35 = vld [vmem:[%s1977_s3 + $0x18] sm:$0xff]  ;;  %v581_v54 = vld [vmem:[%s1977_s3 + $0xd0] sm:$0xff] }
  0x53   :  { %v1044_v48 = vpack.c.bf16 %v251_v42, %v249_v41  ;;  %v575_v36 = vld [vmem:[%s1977_s3 + $0xa0] sm:$0xff]  ;;  %v560_v41 = vld [vmem:[%s1977_s3 + $0x28] sm:$0xff]  ;;  %v577_v42 = vld [vmem:[%s1977_s3 + $0xb0] sm:$0xff] }
  0x54   :  { %1029 = vmatpush1.bf16.msra.mxu1 %v1028_v1  ;;  %v32_v1 = vld [vmem:[%s1976_s0 + $0x30] sm:$0xff]  ;;  %v582_v55 = vld [vmem:[%s1977_s3 + $0xd8] sm:$0xff] }
  0x55   :  { %973 = vmatpush1.bf16.msra.mxu0 %v972_v49  ;;  %1031 = vmatprep.subr.bf16.mxu1 %v1030_v4  ;;  %v994_v49 = vpack.c.bf16 %v204_v43, %v202_v39  ;;  %v211_v4 = vld [vmem:[%s1975_s1 + $0x590] sm:$0xff]  ;;  %v578_v43 = vld [vmem:[%s1977_s3 + $0xb8] sm:$0xff] }
  0x56   :  { %975 = vmatprep.subr.bf16.mxu0 %v974_v53  ;;  %v255_v53 = vld [vmem:[%s1975_s1 + $0x6f0] sm:$0xff]  ;;  %v1004_v7 = vpack.c.bf16 %v211_v4, %v209_v3  ;;  %v1062_v45 = vpack.c.bf16 %v578_v43, %v577_v42  ;;  %v672_v42 = vld [vmem:[%s1979_s5 + $0x38] sm:$0xff] }
  0x57   :  { %v1048_v57 = vpack.c.bf16 %v255_v53, %v253_v52  ;;  %v563_v52 = vld [vmem:[%s1977_s3 + $0x40] sm:$0xff]  ;;  %v564_v53 = vld [vmem:[%s1977_s3 + $0x48] sm:$0xff]  ;;  %v585_v4 = vld [vmem:[%s1977_s3 + $0xf0] sm:$0xff] }
  0x58   :  { %1033 = vmatpush1.bf16.msra.mxu1 %v1032_v13  ;;  %v1078_v6 = vpack.c.bf16 %v586_v5, %v585_v4 }
  0x59   :  { %977 = vmatpush1.bf16.msra.mxu0 %v976_v62  ;;  %1035 = vmatprep.subr.bf16.mxu1 %v1034_v16  ;;  %v210_v62 = vld [vmem:[%s1975_s1 + $0x588] sm:$0xff]  ;;  %v219_v16 = vld [vmem:[%s1975_s1 + $0x5d0] sm:$0xff] }
  0x5a   :  { %979 = vmatprep.subr.bf16.mxu0 %v978_v2  ;;  %v1002_v2 = vpack.c.bf16 %v212_v63, %v210_v62  ;;  %v1012_v19 = vpack.c.bf16 %v219_v16, %v217_v15  ;;  %v583_v62 = vld [vmem:[%s1977_s3 + $0xe0] sm:$0xff]  ;;  %v584_v63 = vld [vmem:[%s1977_s3 + $0xe8] sm:$0xff]  ;;  %v259_v15 = vlaneseq }
  0x5c   :  { %1037 = vmatpush1.bf16.msra.mxu1 %v1036_v25  ;;  %v571_v25 = vld [vmem:[%s1977_s3 + $0x80] sm:$0xff]  ;;  %v260_v16 = vshrl.u32 %v259_v15, 7 }
  0x5d   :  { %981 = vmatpush1.bf16.msra.mxu0 %v980_v10  ;;  %1039 = vmatprep.subr.bf16.mxu1 %v1038_v28  ;;  %v215_v10 = vld [vmem:[%s1975_s1 + $0x5b0] sm:$0xff] }
  0x5e   :  { %983 = vmatprep.subr.bf16.mxu0 %v982_v14  ;;  %v1008_v13 = vpack.c.bf16 %v215_v10, %v213_v9  ;;  %v1010_v14 = vpack.c.bf16 %v220_v12, %v218_v11  ;;  %v1106_v10 = vmov 0.0|0.0   ;;  %v261_v17 = vsub.s32 0, %v260_v16 }
  0x60   :  { %1041 = vmatpush1.bf16.msra.mxu1 %v1040_v37  ;;  %v576_v37 = vld [vmem:[%s1977_s3 + $0xa8] sm:$0xff] }
  0x61   :  { %985 = vmatpush1.bf16.msra.mxu0 %v984_v22  ;;  %1043 = vmatprep.subr.bf16.mxu1 %v1042_v40  ;;  %v223_v22 = vld [vmem:[%s1975_s1 + $0x5f0] sm:$0xff]  ;;  %v1058_v39 = vpack.c.bf16 %v576_v37, %v575_v36  ;;  %v559_v40 = vld [vmem:[%s1977_s3 + $0x20] sm:$0xff]  ;;  %v668_v36 = vld [vmem:[%s1979_s5 + $0x18] sm:$0xff] }
  0x62   :  { %987 = vmatprep.subr.bf16.mxu0 %v986_v26  ;;  %v1016_v23 = vpack.c.bf16 %v223_v22, %v221_v21  ;;  %v572_v26 = vld [vmem:[%s1977_s3 + $0x88] sm:$0xff]  ;;  %v1060_v44 = vpack.c.bf16 %v560_v41, %v559_v40  ;;  %v671_v41 = vld [vmem:[%s1979_s5 + $0x30] sm:$0xff] }
  0x63   :  { %v1050_v28 = vpack.c.bf16 %v572_v26, %v571_v25  ;;  %v1092_v43 = vpack.c.bf16 %v672_v42, %v671_v41 }
  0x64   :  { %1045 = vmatpush1.bf16.msra.mxu1 %v1044_v48  ;;  %v579_v48 = vld [vmem:[%s1977_s3 + $0xc0] sm:$0xff] }
  0x65   :  { %989 = vmatpush1.bf16.msra.mxu0 %v988_v34  ;;  %1047 = vmatprep.subr.bf16.mxu1 %v1046_v51  ;;  %v557_v34 = vld [vmem:[%s1977_s3 + $0x10] sm:$0xff] }
  0x66   :  { %991 = vmatprep.subr.bf16.mxu0 %v990_v38  ;;  %v1056_v38 = vpack.c.bf16 %v558_v35, %v557_v34  ;;  %v667_v35 = vld [vmem:[%s1979_s5 + $0x10] sm:$0xff] }
  0x67   :  { %v1086_v37 = vpack.c.bf16 %v668_v36, %v667_v35 }
  0x68   :  { %1049 = vmatpush1.bf16.msra.mxu1 %v1048_v57  ;;  %v1070_v57 = vpack.c.bf16 %v582_v55, %v581_v54 }
  0x69   :  { %993 = vmatpush1.bf16.msra.mxu0 %v992_v46  ;;  %1051 = vmatprep.subr.bf16.mxu1 %v1050_v28  ;;  %v561_v46 = vld [vmem:[%s1977_s3 + $0x30] sm:$0xff] }
  0x6a   :  { %995 = vmatprep.subr.bf16.mxu0 %v994_v49  ;;  %v580_v49 = vld [vmem:[%s1977_s3 + $0xc8] sm:$0xff]  ;;  %v1064_v50 = vpack.c.bf16 %v562_v47, %v561_v46 }
  0x6b   :  { %547 = vmatmul.mubr.f32.vlgmr.msra.gmra.mrb[2].mxu1 %v32_v1  ;;  %v1066_v51 = vpack.c.bf16 %v580_v49, %v579_v48  ;;  %v567_v1 = vld [vmem:[%s1977_s3 + $0x60] sm:$0xff] }
  0x6c   :  { %1053 = vmatpush3.bf16.msra.mxu1 %v1052_v32 }
  0x6d   :  { %997 = vmatpush1.bf16.msra.mxu0 %v996_v56  ;;  %1055 = vmatprep.subr.bf16.mxu1 %v1054_v33  ;;  %v1068_v56 = vpack.c.bf16 %v564_v53, %v563_v52  ;;  %v1083_v33 = vpack.c.bf16 %v666_v30, %v665_v29 }
  0x6e   :  { %999 = vmatprep.subr.bf16.mxu0 %v998_v58  ;;  %v565_v58 = vld [vmem:[%s1977_s3 + $0x50] sm:$0xff] }
  0x6f   :  { %v1072_v60 = vpack.c.bf16 %v566_v59, %v565_v58 }
  0x70   :  { %1057 = vmatpush3.bf16.msra.mxu1 %v1056_v38  ;;  %v669_v38 = vld [vmem:[%s1979_s5 + $0x20] sm:$0xff] }
  0x71   :  { %1001 = vmatpush1.bf16.msra.mxu0 %v1000_v0  ;;  %1059 = vmatprep.subr.bf16.mxu1 %v1058_v39  ;;  %v1074_v0 = vpack.c.bf16 %v584_v63, %v583_v62  ;;  %v670_v39 = vld [vmem:[%s1979_s5 + $0x28] sm:$0xff] }
  0x72   :  { %1003 = vmatprep.subr.bf16.mxu0 %v1002_v2  ;;  %v568_v2 = vld [vmem:[%s1977_s3 + $0x68] sm:$0xff]  ;;  %v1089_v40 = vpack.c.bf16 %v670_v39, %v669_v38 }
  0x73   :  { %v1076_v3 = vpack.c.bf16 %v568_v2, %v567_v1 }
  0x74   :  { %1061 = vmatpush3.bf16.msra.mxu1 %v1060_v44 }
  0x75   :  { %1005 = vmatpush1.bf16.msra.mxu0 %v1004_v7  ;;  %1063 = vmatprep.subr.bf16.mxu1 %v1062_v45  ;;  %v569_v7 = vld [vmem:[%s1977_s3 + $0x70] sm:$0xff]  ;;  %v760_v45 = vld [vmem:[%s1980_s4] ss:$0 sm:$0xff] }
  0x76   :  { %1007 = vmatprep.subr.bf16.mxu0 %v1006_v8  ;;  %v570_v8 = vld [vmem:[%s1977_s3 + $0x78] sm:$0xff] }
  0x77   :  { %v1080_v9 = vpack.c.bf16 %v570_v8, %v569_v7 }
  0x78   :  { %1065 = vmatpush3.bf16.msra.mxu1 %v1064_v50  ;;  %v761_v50 = vld [vmem:[%s1981_s6] ss:$0 sm:$0xff] }
  0x79   :  { %1009 = vmatpush1.bf16.msra.mxu0 %v1008_v13  ;;  %1067 = vmatprep.subr.bf16.mxu1 %v1066_v51 }
  0x7a   :  { %1011 = vmatprep.subr.bf16.mxu0 %v1010_v14 }
  0x7c   :  { %1069 = vmatpush3.bf16.msra.mxu1 %v1068_v56 }
  0x7d   :  { %1013 = vmatpush1.bf16.msra.mxu0 %v1012_v19  ;;  %1071 = vmatprep.subr.bf16.mxu1 %v1070_v57  ;;  %v265_v19 = vsub.s32 1, %v260_v16 }
  0x7e   :  { %1015 = vmatprep.subr.bf16.mxu0 %v1014_v20  ;;  %v262_v20 = vrot.slane %v257_v18, %v261_v17 }
  0x7f   :  { %v266_v21 = vrot.slane %v257_v18, %v265_v19 }
  0x80   :  { %1073 = vmatpush3.bf16.msra.mxu1 %v1072_v60 }
  0x81   :  { %1017 = vmatpush1.bf16.msra.mxu0 %v1016_v23  ;;  %1075 = vmatprep.subr.bf16.mxu1 %v1074_v0 }
  0x84   :  { %476 = vmatmul.mubr.f32.vlgmr.msra.gmra.mrb[0].mxu0 %v30_v24  ;;  %1077 = vmatpush3.bf16.msra.mxu1 %v1076_v3 }
  0x85   :  { %1079 = vmatprep.subr.bf16.mxu1 %v1078_v6 }
  0x88   :  { %1081 = vmatpush3.bf16.msra.mxu1 %v1080_v9 }
  0x89   :  { %1082 = vmatprep.subr.bf16.mxu1 %v1106_v10 }
 0x11e   :  { %v335_v11 = vpop.f32.mrb[0].mxu1 }
 0x11f   :  { %v337_v12 = vpop.f32.mrb[1].mxu1  ;;  %v336_v22 = vadd.f32 %v335_v11, %v262_v20 }
 0x120   :  { %v338_v23 = vadd.f32 %v337_v12, %v266_v21 }
 0x13e   :  { %v548_v13 = vpop.f32.mrb[2].mxu1 }
 0x13f   :  { %v550_v14 = vpop.f32.mrb[3].mxu1 }
 0x157   :  { %v477_v24 = vpop.f32.mrb[0].mxu0 }
 0x158   :  { %v1095_v25 = vadd.f32 %v477_v24, %v336_v22  ;;  %v479_v26 = vpop.f32.mrb[1].mxu0 }
 0x159   :  { %v1098_v27 = vadd.f32 %v479_v26, %v338_v23 }
 0x15a   :  { %v1096_v28 = vadd.f32 %v1095_v25, %v548_v13 }
 0x15b   :  { %v1099_v31 = vadd.f32 %v1098_v27, %v550_v14 }
 0x15c   :  { %v553_v34 = vmul.f32 %v1096_v28, %v1096_v28 }
 0x15d   :  { %v554_v32 = vmul.f32 %v1099_v31, %v1099_v31 }
 0x15f   :  { %658 = vmatprep.mubr.f32.mxu1 %v554_v32 }
 0x160   :  { %659 = vmatmul.mubr.f32.vlgmr.msra.gmra.mrb[4].mxu1 %v553_v34 }
 0x161   :  { %1084 = vmatpush3.bf16.msra.mxu1 %v1083_v33  ;;  %823 = vmatprep.mubr.msk.f32.mxu1 %vm1107_vm0, %v1105_v61 }
 0x162   :  { %1085 = vmatprep.subr.bf16.mxu1 %v1106_v10 }
 0x165   :  { %1087 = vmatpush3.bf16.msra.mxu1 %v1086_v37 }
 0x166   :  { %1088 = vmatprep.subr.bf16.mxu1 %v1106_v10 }
 0x169   :  { %1090 = vmatpush3.bf16.msra.mxu1 %v1089_v40 }
 0x16a   :  { %1091 = vmatprep.subr.bf16.mxu1 %v1106_v10 }
 0x16d   :  { %1093 = vmatpush3.bf16.msra.mxu1 %v1092_v43 }
 0x233   :  { %v795_v44 = vpop.f32.mrb[4].mxu1 }
 0x234   :  { %v796_v46 = vpop.f32.mrb[5].mxu1 }
 0x235   :  { %v797_v47 = vadd.f32 %v796_v46, %v795_v44 }
 0x237   :  { %v661_v48 = vadd.f32 %v797_v47, %v760_v45 }
 0x239   :  { %v664_v49 = vmul.f32 %v661_v48, %v661_v48 }
 0x23b   :  { %824 = vmatmul.mubr.msk.f32.vlgmr.msra.gmra.mrb[6].mxu1 %vm680_vm1, %v664_v49 }
 0x30e   :  { %v750_v51 = vpop.f32.mrb[6].mxu1 }
 0x30f   :  { %v751_v52 = vadd.f32 %v761_v50, %v750_v51  ;;  %v825_v53 = vpop.f32.mrb[7].mxu1 }
 0x311   :  { %755 = vst.msk [vmem:[%s1982_s7] sm:$0xff] %vm754_vm2, %v751_v52 }

</bundles_post_ra>
